<compile_context>
chip_gen: v7x
topology: tpu7x:2x2x1
jax: 0.10.0
libtpu: 0.0.40
codegen_flags: <defaults>
</compile_context>

<pallas_src>
import functools

import jax
import jax.numpy as jnp
from jax.experimental import pallas as pl
from jax.experimental.pallas import tpu as pltpu


def _round_up(x, m):
    return (x + m - 1) // m * m


def _conv_relu_res_kernel(x_ref, xh_ref, w_ref, b_ref, o_ref, *,
                          filter_sz, l_off, do_res):
    # x_ref : (1, C_in, TT)    main input tile, time-aligned with the output tile
    # xh_ref: (1, C_in, 128)   right halo (next 128-aligned chunk of the same input)
    # w_ref : (F, C_out, C_in) per-tap weights (resident, constant index map)
    # b_ref : (C_out, 1)       bias, f32
    # o_ref : (1, C_out, TT)   output tile, f32
    tt = o_ref.shape[-1]

    # Working slab: main tile + halo as one (C_in, TT+128) value in the compute dtype.
    xw = jnp.concatenate([x_ref[0], xh_ref[0]], axis=-1)

    # F accumulating taps (K = C_in each).  No (F*C_in, TT) im2col slab is built in
    # VMEM; the shifted views feed the MXU directly and accumulate in f32.
    acc = jnp.dot(w_ref[0], xw[:, :tt], preferred_element_type=jnp.float32)
    for k in range(1, filter_sz):
        acc = acc + jnp.dot(w_ref[k], xw[:, k:k + tt],
                            preferred_element_type=jnp.float32)

    acc = acc + b_ref[...]           # bias broadcasts over time (f32)
    acc = jnp.maximum(acc, 0.0)      # ReLU
    if do_res:
        # Residual add with the cropped input: reuse the l_off-shifted view of xw.
        acc = acc + xw[:, l_off:l_off + tt].astype(jnp.float32)

    o_ref[0] = acc.astype(o_ref.dtype)


def conv_relu_res(x, weight, bias, *, filter_sz, do_res=True, tile_t=1024,
                  compute_dtype=None):
    """x: (B, C_in, T); weight: (C_out, C_in, F) (PyTorch layout); bias: (C_out,).

    Output is f32 of shape (B, C_out, T - F + 1), matching the PyTorch forward.
    compute_dtype (e.g. jnp.bfloat16 on v6e/v7x) sets the MXU operand dtype; if the
    caller already supplies x in that dtype, no extra HBM cast pass is made.
    """
    B, C_in, T = x.shape
    C_out = weight.shape[0]
    F = filter_sz
    if weight.shape != (C_out, C_in, F):
        raise ValueError("weight must have shape (C_out, C_in, filter_sz)")
    T_out = T - F + 1
    l_off = (F - 1) // 2                    # rfield crop offset (odd filters)

    if do_res and C_in != C_out:
        raise ValueError("residual connection requires n_in_chan == n_out_chan")
    if T_out < 1:
        raise ValueError("input window shorter than filter")

    HALO = 128                              # one lane-aligned halo block
    if F - 1 > HALO:
        raise ValueError("filter_sz too large for a single 128-wide halo block")

    cdt = jnp.dtype(compute_dtype) if compute_dtype is not None else x.dtype
    xc = x if x.dtype == cdt else x.astype(cdt)
    w3 = jnp.transpose(weight, (2, 0, 1)).astype(cdt)        # (F, C_out, C_in)
    b2 = bias.reshape(C_out, 1).astype(jnp.float32)

    # Lane-dense time tiles (multiple of 128).  The last tile may be ragged; Pallas
    # masks its out-of-bounds output columns on store.
    tt = min(_round_up(tile_t, HALO), _round_up(T_out, HALO))
    n_t = pl.cdiv(T_out, tt)
    bpt = tt // HALO
    max_hb = (T - 1) // HALO                # last halo block whose DMA starts in-bounds

    itm = jnp.dtype(cdt).itemsize
    # VMEM budget: double-buffered blocks + resident weights + in-kernel temporaries.
    # TODO(synk): for large C_out, add a C_out grid axis before C_out*tt*4 approaches ~8-16 MiB.
    est = (2 * C_in * (tt + HALO) * itm               # x main + halo blocks (x2 buffers)
           + 2 * C_out * tt * 4                       # output block (x2 buffers)
           + 2 * (F * C_out * C_in * itm + C_out * 4)  # resident weights + bias
           + C_in * (tt + HALO) * itm                 # xw working slab
           + 2 * C_in * tt * itm                      # shifted-view / residual temps
           + 2 * C_out * tt * 4)                      # acc + store cast
    vmem_limit = int(min(max(2 * est, 32 << 20), 48 << 20))

    flops = 2 * B * C_out * C_in * F * T_out
    bytes_accessed = (B * C_in * T * itm + F * C_out * C_in * itm + C_out * 4
                      + B * C_out * T_out * 4)

    kernel = functools.partial(_conv_relu_res_kernel,
                               filter_sz=F, l_off=l_off, do_res=do_res)

    return pl.pallas_call(
        kernel,
        out_shape=jax.ShapeDtypeStruct((B, C_out, T_out), jnp.float32),
        grid_spec=pltpu.PrefetchScalarGridSpec(
            num_scalar_prefetch=0,
            grid=(B, n_t),
            in_specs=[
                # Main input tile: (C_in, TT) starting at element j*TT.
                pl.BlockSpec((1, C_in, tt), lambda b, j: (b, 0, j)),
                # Halo: next 128-wide aligned chunk; clamp so the DMA start stays
                # in-bounds on the last (possibly ragged) tile.
                pl.BlockSpec((1, C_in, HALO),
                             lambda b, j: (b, 0, jnp.minimum((j + 1) * bpt, max_hb))),
                # Weights / bias: constant index maps -> fetched once, stay resident.
                pl.BlockSpec((F, C_out, C_in), lambda b, j: (0, 0, 0)),
                pl.BlockSpec((C_out, 1), lambda b, j: (0, 0)),
            ],
            out_specs=pl.BlockSpec((1, C_out, tt), lambda b, j: (b, 0, j)),
        ),
        compiler_params=pltpu.CompilerParams(
            dimension_semantics=("parallel", "parallel"),
            vmem_limit_bytes=vmem_limit,
        ),
        cost_estimate=pl.CostEstimate(flops=flops, transcendentals=0,
                                      bytes_accessed=bytes_accessed),
    )(xc, xc, w3, b2)


def _reference(x, weight, bias, filter_sz, do_res=True):
    # Plain-JAX reference of the PyTorch forward (NCW conv, valid padding).
    out = jax.lax.conv_general_dilated(
        x.astype(jnp.float32), weight.astype(jnp.float32),
        window_strides=(1,), padding="VALID",
        dimension_numbers=("NCH", "OIH", "NCH"),
    ) + bias.reshape(1, -1, 1)
    out = jnp.maximum(out, 0.0)
    if do_res:
        T_out = out.shape[-1]
        l_off = (filter_sz - 1) // 2
        out = out + x[:, :, l_off:l_off + T_out].astype(jnp.float32)
    return out


def _make(key, B, C_in, C_out, T, F):
    kx, kw, kb = jax.random.split(key, 3)
    x = jax.random.normal(kx, (B, C_in, T), dtype=jnp.float32)
    w = jax.random.normal(kw, (C_out, C_in, F), dtype=jnp.float32) * 0.1
    b = jax.random.normal(kb, (C_out,), dtype=jnp.float32) * 0.1
    return x, w, b


if __name__ == "__main__":
    B, C = 2, 8

    # 1) Tiny single-tile case (T_out = 14 < 128): exercises the partial/masked tile.
    x, w, b = _make(jax.random.PRNGKey(0), B, C, C, 16, 3)
    out = jax.block_until_ready(conv_relu_res(x, w, b, filter_sz=3, do_res=True))
    ref = _reference(x, w, b, 3, do_res=True)
    assert out.shape == (B, C, 14)
    assert jnp.allclose(out, ref, atol=1e-4, rtol=1e-4), "mismatch (single tile)"

    # 2) Multi-tile + ragged last tile + halo crossing.
    #    (tile_t=128 here is only for coverage; production shapes use the >=1024 default.)
    x, w, b = _make(jax.random.PRNGKey(1), B, C, C, 300, 3)
    out = jax.block_until_ready(
        conv_relu_res(x, w, b, filter_sz=3, do_res=True, tile_t=128))
    ref = _reference(x, w, b, 3, do_res=True)
    assert out.shape == (B, C, 298)
    assert jnp.allclose(out, ref, atol=1e-4, rtol=1e-4), "mismatch (multi tile)"

    # 3) T_out exactly divisible by the tile, F=5: the last tile needs the halo.
    x, w, b = _make(jax.random.PRNGKey(2), B, C, C, 260, 5)
    out = jax.block_until_ready(
        conv_relu_res(x, w, b, filter_sz=5, do_res=True, tile_t=128))
    ref = _reference(x, w, b, 5, do_res=True)
    assert out.shape == (B, C, 256)
    assert jnp.allclose(out, ref, atol=1e-4, rtol=1e-4), "mismatch (halo on last tile)"

    # 4) No-residual path with C_out != C_in.
    x, w, b = _make(jax.random.PRNGKey(3), B, C, 16, 64, 3)
    out = jax.block_until_ready(conv_relu_res(x, w, b, filter_sz=3, do_res=False))
    ref = _reference(x, w, b, 3, do_res=False)
    assert out.shape == (B, 16, 62)
    assert jnp.allclose(out, ref, atol=1e-4, rtol=1e-4), "mismatch (no residual)"

    # 5) bf16 MXU-operand path (v6e/v7x); f32 accumulation, relaxed tolerance.
    x, w, b = _make(jax.random.PRNGKey(4), B, C, C, 300, 3)
    out = jax.block_until_ready(
        conv_relu_res(x.astype(jnp.bfloat16), w, b, filter_sz=3, do_res=True,
                      tile_t=128))
    ref = _reference(x, w, b, 3, do_res=True)
    assert out.shape == (B, C, 298)
    assert jnp.allclose(out, ref, atol=3e-2, rtol=3e-2), "mismatch (bf16 operands)"

    print("KERNEL_OK")
</pallas_src>

<mosaic_0001>
module attributes {stable_mosaic.version = 11 : i64} {
  func.func @_conv_relu_res_kernel(%arg0: i32, %arg1: i32, %arg2: memref<1x8x128xf32, #tpu.memory_space<vmem>>, %arg3: memref<1x8x128xf32, #tpu.memory_space<vmem>>, %arg4: memref<3x8x8xf32, #tpu.memory_space<vmem>>, %arg5: memref<8x1xf32, #tpu.memory_space<vmem>>, %arg6: memref<1x8x128xf32, #tpu.memory_space<vmem>>) attributes {dimension_semantics = [#tpu.dimension_semantics<parallel>, #tpu.dimension_semantics<parallel>], iteration_bounds = array<i64: 2, 1>, scalar_prefetch = 0 : i64, scratch_operands = 0 : i64, tpu.core_type = #tpu.core_type<tc>, window_params = [{transform_indices = @transform_0, window_bounds = array<i64: 1, 8, 128>}, {transform_indices = @transform_1, window_bounds = array<i64: 1, 8, 128>}, {pipeline_mode = #tpu.pipeline_mode<synchronous>, transform_indices = @transform_2, window_bounds = array<i64: 3, 8, 8>}, {pipeline_mode = #tpu.pipeline_mode<synchronous>, transform_indices = @transform_3, window_bounds = array<i64: 8, 1>}, {transform_indices = @transform_4, window_bounds = array<i64: 1, 8, 128>}]} {
    %c0 = arith.constant 0 : index
    %c0_0 = arith.constant 0 : index
    %c0_1 = arith.constant 0 : index
    %0 = vector.load %arg2[%c0, %c0_0, %c0_1] : memref<1x8x128xf32, #tpu.memory_space<vmem>>, vector<1x8x128xf32>
    %1 = vector.shape_cast %0 : vector<1x8x128xf32> to vector<8x128xf32>
    %c0_2 = arith.constant 0 : index
    %c0_3 = arith.constant 0 : index
    %c0_4 = arith.constant 0 : index
    %2 = vector.load %arg3[%c0_2, %c0_3, %c0_4] : memref<1x8x128xf32, #tpu.memory_space<vmem>>, vector<1x8x128xf32>
    %3 = vector.shape_cast %2 : vector<1x8x128xf32> to vector<8x128xf32>
    %4 = tpu.concatenate %1, %3 in 1 : vector<8x128xf32>, vector<8x128xf32> -> vector<8x256xf32>
    %c0_5 = arith.constant 0 : index
    %c0_6 = arith.constant 0 : index
    %c0_7 = arith.constant 0 : index
    %5 = vector.load %arg4[%c0_5, %c0_6, %c0_7] : memref<3x8x8xf32, #tpu.memory_space<vmem>>, vector<1x8x8xf32>
    %6 = vector.shape_cast %5 : vector<1x8x8xf32> to vector<8x8xf32>
    %7 = vector.extract_strided_slice %4 {offsets = [0, 0], sizes = [8, 128], strides = [1, 1]} : vector<8x256xf32> to vector<8x128xf32>
    %cst = arith.constant dense<0.000000e+00> : vector<8x128xf32>
    %8 = tpu.matmul %6, %7, %cst {dimension_numbers = #tpu.dot_dimension_numbers<[1], [0], [0], [1], [0, 0, 1, 1], [], []>} : vector<8x8xf32>, vector<8x128xf32>, vector<8x128xf32> -> vector<8x128xf32>
    %c1 = arith.constant 1 : index
    %c0_8 = arith.constant 0 : index
    %c0_9 = arith.constant 0 : index
    %9 = vector.load %arg4[%c1, %c0_8, %c0_9] : memref<3x8x8xf32, #tpu.memory_space<vmem>>, vector<1x8x8xf32>
    %10 = vector.shape_cast %9 : vector<1x8x8xf32> to vector<8x8xf32>
    %11 = vector.extract_strided_slice %4 {offsets = [0, 1], sizes = [8, 128], strides = [1, 1]} : vector<8x256xf32> to vector<8x128xf32>
    %cst_10 = arith.constant dense<0.000000e+00> : vector<8x128xf32>
    %12 = tpu.matmul %10, %11, %cst_10 {dimension_numbers = #tpu.dot_dimension_numbers<[1], [0], [0], [1], [0, 0, 1, 1], [], []>} : vector<8x8xf32>, vector<8x128xf32>, vector<8x128xf32> -> vector<8x128xf32>
    %13 = arith.addf %8, %12 : vector<8x128xf32>
    %c2 = arith.constant 2 : index
    %c0_11 = arith.constant 0 : index
    %c0_12 = arith.constant 0 : index
    %14 = vector.load %arg4[%c2, %c0_11, %c0_12] : memref<3x8x8xf32, #tpu.memory_space<vmem>>, vector<1x8x8xf32>
    %15 = vector.shape_cast %14 : vector<1x8x8xf32> to vector<8x8xf32>
    %16 = vector.extract_strided_slice %4 {offsets = [0, 2], sizes = [8, 128], strides = [1, 1]} : vector<8x256xf32> to vector<8x128xf32>
    %cst_13 = arith.constant dense<0.000000e+00> : vector<8x128xf32>
    %17 = tpu.matmul %15, %16, %cst_13 {dimension_numbers = #tpu.dot_dimension_numbers<[1], [0], [0], [1], [0, 0, 1, 1], [], []>} : vector<8x8xf32>, vector<8x128xf32>, vector<8x128xf32> -> vector<8x128xf32>
    %18 = arith.addf %13, %17 : vector<8x128xf32>
    %c0_14 = arith.constant 0 : index
    %c0_15 = arith.constant 0 : index
    %19 = vector.load %arg5[%c0_14, %c0_15] : memref<8x1xf32, #tpu.memory_space<vmem>>, vector<8x1xf32>
    %20 = vector.broadcast %19 : vector<8x1xf32> to vector<8x128xf32>
    %21 = arith.addf %18, %20 : vector<8x128xf32>
    %cst_16 = arith.constant 0.000000e+00 : f32
    %22 = vector.broadcast %cst_16 : f32 to vector<8x128xf32>
    %23 = arith.maximumf %21, %22 : vector<8x128xf32>
    %24 = vector.extract_strided_slice %4 {offsets = [0, 1], sizes = [8, 128], strides = [1, 1]} : vector<8x256xf32> to vector<8x128xf32>
    %25 = arith.addf %23, %24 : vector<8x128xf32>
    %c0_17 = arith.constant 0 : index
    %c0_18 = arith.constant 0 : index
    %c0_19 = arith.constant 0 : index
    %26 = vector.load %arg6[%c0_17, %c0_18, %c0_19] : memref<1x8x128xf32, #tpu.memory_space<vmem>>, vector<1x8x128xf32>
    %27 = vector.shape_cast %26 : vector<1x8x128xf32> to vector<8x128xf32>
    %28 = vector.shape_cast %25 : vector<8x128xf32> to vector<1x8x128xf32>
    tpu.vector_store %arg6[%c0_17, %c0_18, %c0_19], %28 {strides = array<i32>} : memref<1x8x128xf32, #tpu.memory_space<vmem>>, vector<1x8x128xf32>,
    return
  }
  func.func @transform_0(%arg0: i32, %arg1: i32) -> (i32, i32, i32) {
    %c0_i32 = arith.constant 0 : i32
    %c0_i32_0 = arith.constant 0 : i32
    return %arg0, %c0_i32, %arg1 : i32, i32, i32
  }
  func.func @transform_1(%arg0: i32, %arg1: i32) -> (i32, i32, i32) {
    %c1_i32 = arith.constant 1 : i32
    %0 = arith.addi %arg1, %c1_i32 : i32
    %c1_i32_0 = arith.constant 1 : i32
    %1 = arith.muli %0, %c1_i32_0 : i32
    %c0_i32 = arith.constant 0 : i32
    %2 = arith.minsi %1, %c0_i32 : i32
    %c0_i32_1 = arith.constant 0 : i32
    %c0_i32_2 = arith.constant 0 : i32
    return %arg0, %c0_i32_1, %2 : i32, i32, i32
  }
  func.func @transform_2(%arg0: i32, %arg1: i32) -> (i32, i32, i32) {
    %c0_i32 = arith.constant 0 : i32
    %c0_i32_0 = arith.constant 0 : i32
    %c0_i32_1 = arith.constant 0 : i32
    %c0_i32_2 = arith.constant 0 : i32
    return %c0_i32, %c0_i32_0, %c0_i32_1 : i32, i32, i32
  }
  func.func @transform_3(%arg0: i32, %arg1: i32) -> (i32, i32) {
    %c0_i32 = arith.constant 0 : i32
    %c0_i32_0 = arith.constant 0 : i32
    %c0_i32_1 = arith.constant 0 : i32
    return %c0_i32, %c0_i32_0 : i32, i32
  }
  func.func @transform_4(%arg0: i32, %arg1: i32) -> (i32, i32, i32) {
    %c0_i32 = arith.constant 0 : i32
    %c0_i32_0 = arith.constant 0 : i32
    return %arg0, %c0_i32, %arg1 : i32, i32, i32
  }
}

</mosaic_0001>

<bundles_post_ra>
// kernel: tpu_custom_call.1
= control target key start
LH: loop header
LB: loop body
LE: loop exit
PB: predicated region body
PF: predicated region fallthrough
CT: control target
= control target key end

     0   :  { %s1282_s0 = inlined_call_operand.hbm [shape: f32[2,8,16], index: 0, kind: input, shape index: {}]   ;;  %s1283_s1 = inlined_call_operand.hbm [shape: f32[2,8,16], index: 1, kind: input, shape index: {}]   ;;  %s1284_s2 = inlined_call_operand.hbm [shape: f32[3,8,8], index: 2, kind: input, shape index: {}]   ;;  %s1285_s3 = inlined_call_operand.vmem [shape: f32[8,1], index: 3, kind: input, shape index: {}]   ;;  %s1286_s4 = inlined_call_operand.hbm [shape: f32[2,8,14], index: 4, kind: output, shape index: {}]  }
   0x1   :  { %1293 = sst [smem:[#allocation15_spill]] %s1284_s2 }
   0x2   :  { %9 = vsyncpa [#allocation3], 0 }
   0x3   :  { %11 = vsyncpa [#allocation3 + $0x1], 0 }
   0x4   :  { %12 = vsyncpa [#allocation6], 0 }
   0x5   :  { %14 = vsyncpa [#allocation6 + $0x1], 0 }
   0x6   :  { %15 = vsyncpa [#allocation4], 0 }
   0x7   :  { %17 = vsyncpa [#allocation4 + $0x1], 0  ;;  %s1022_s15 = smov 0   ;;  %s1024_s16 = smov 0  }
   0x8   :  { %s1026_s17 = smov 0   ;;  %s1028_s18 = smov 0  }
   0x9   :  { %s1030_s19 = smov 0   ;;  %s1032_s20 = smov 0  }
   0xa LB: > { %1294 = sst [smem:[#allocation13_spill]] %s980_s19  ;;  %s1053_s21 = sadd.s32 4294967295, %s984_s20   ;;  %s984_s20 = sphi %s1032_s20, %s23_s20   ;;  %s980_s19 = sphi %s1030_s19, %s1313_s19   ;;  %s976_s18 = sphi %s1028_s18, %s1312_s18   ;;  %s972_s17 = sphi %s1026_s17, %s1316_s17   ;;  %s968_s16 = sphi %s1024_s16, %s1315_s16   ;;  %s964_s15 = sphi %s1022_s15, %s1314_s15  }
   0xb   : > { %s679_s22 = sadd.s32 4294967294, %s984_s20   ;;  %p57_p0 = scmp.ne.s32.totalorder %s968_s16, %s964_s15 }
   0xc   : > { %p1287_p1 = scmp.eq.s32.totalorder %s1053_s21, 0  ;;  %p165_p3 = scmp.eq.s32.totalorder %s679_s22, 1 }
   0xd   : > { %p680_p5 = scmp.ge.s32.totalorder %s984_s20, 1  ;;  %p172_p7 = scmp.lt.s32.totalorder %s984_s20, 3 }
   0xe   : > { %p1062_p4 = por %p1287_p1, %p57_p0  ;;  %p1067_p6 = por %p165_p3, %p57_p0 }
   0xf   : > { %p1072_p8 = pnand %p680_p5, %p172_p7  ;;  %s986_s26 = smov [#allocation7]  }
  0x10   : > { %s1295_s23 = scalar_select %p1062_p4, 1, 0 }
  0x11   : > { %s1296_s24 = scalar_select %p1067_p6, 1, 0 }
  0x12   : > { %s1297_s25 = scalar_select %p1072_p8, 1, 0 }
  0x13   : > { %s184_s27 = sshll.u32 %s986_s26, 4  ;;  %p730_p9 = pneg %p1072_p8  ;;  %s185_s27 = int_to_ptr.vmem [resolvable:$true] %s184_s27 }
  0x14   : > { %s35_s29 = sadd.s32 1, %s980_s19  ;;  %s1299_s2 = sld [smem:[#allocation15_spill]] }
  0x15   : > { %p1081_p11 = pnand %p730_p9, %p1287_p1 }
  0x17   : > { %p808_p13 = pneg %p1081_p11 }
  0x1a   : > { %s806_s6 = scalar_lea.hbm %s1299_s2, 384 }
  0x1b   : > { %p807_p12 = scmp.ne.s32.totalorder %s1299_s2, %s806_s6  ;;  %p813_p5 = scmp.lt.u32.totalorder %s806_s6, %s1299_s2 }
  0x1d   : > { %p809_p0 = pnand %p808_p13, %p807_p12 }
  0x1f   : > { %p810_p3 = pneg %p809_p0 }
  0x21   : > { %p815_p7 = pnand %p813_p5, %p810_p3 }
  0x23   : > { %818 = shalt.err (!%p815_p7)
}
  0x24   : > { %s819_s11 = scalar_lea.vmem %s185_s27, 384  ;;  %p827_p2 = scmp.lt.s32.totalorder %s185_s27, %s185_s27 }
  0x25   : > { %p820_p9 = scmp.ne.s32.totalorder %s185_s27, %s819_s11  ;;  %p828_p6 = scmp.lt.s32.totalorder %s819_s11, %s819_s11 }
  0x27   : > { %p822_p10 = pnand %p820_p9, %p808_p13  ;;  %p829_p4 = por %p828_p6, %p827_p2 }
  0x29   : > { %p823_p1 = pneg %p822_p10 }
  0x2b   : > { %p830_p8 = pnand %p829_p4, %p823_p1 }
  0x2d   : > { %833 = shalt.err (!%p830_p8)
}
  0x2e   : > { %s987_s12 = smov 128   ;;  %s988_s13 = smov 8  }
  0x2f   : > { %733 = dma.hbm_to_vmem [thread:$0]  (!%p1081_p11), %s1299_s2, 384, %s185_s27, [#allocation6], %s987_s12, %s987_s12, %s988_s13  }
  0x30   : > { %p37_p1 = scmp.ge.s32.totalorder %s35_s29, 2  ;;  %s44_s26 = sadd.s32 1, %s972_s17 }
  0x31   : > { %p51_p2 = scmp.ne.s32.totalorder %s972_s17, %s968_s16  ;;  %p52_p4 = scmp.eq.s32.totalorder %s984_s20, 0 }
  0x32   : > { %s1318_s29 = smov (%p37_p1, %s35_s29), 0  ;;  %p1302_p8 = scmp.eq.s32.totalorder %s1053_s21, 1 }
  0x33   : > { %1300 = sst [smem:[#allocation14_spill]] %s1318_s29  ;;  %p1108_p6 = por %p52_p4, %p51_p2 }
  0x34   : > { %p1114_p10 = por %p1302_p8, %p51_p2  ;;  %s39_s5 = ssub.s32 %s980_s19, %s1318_s29 }
  0x35   : > { %p746_p11 = scmp.lt.s32.totalorder %s984_s20, 2  ;;  %p42_p12 = scmp.eq.s32.totalorder %s39_s5, 0 }
  0x36   : > { %s1303_s28 = scalar_select %p1114_p10, 1, 0 }
  0x37   : > { %s201_s27 = sand.u32 1, %s972_s17   ;;  %s684_s8 = sshll.u32 %s980_s19, 7 }
  0x38   : > { %s1122_s6 = sshll.u32 %s201_s27, 3  ;;  %s1131_s11 = scalar_lea.hbm %s1282_s0, %s684_s8 }
  0x39   : > { %s1125_s7 = scalar_select %p42_p12, %s972_s17, %s44_s26  }
  0x3a   : > { %s205_s12 = scalar_lea.vmem [#allocation2], %s1122_s6  ;;  %p1138_p13 = pnand %p746_p11, %p1108_p6 }
  0x3b   : > { %s213_s13 = sshll.u32 %s205_s12, 4  ;;  %s1145_s5 = scalar_lea.hbm %s1283_s1, %s684_s8  ;;  %s1134_s13 = int_to_ptr.vmem [resolvable:$true] %s213_s13 }
  0x3c   : > { %s220_s9 = sand.u32 1, %s984_s20   ;;  %s202_s10 = scalar_lea.sflag [#allocation3], %s201_s27 }
  0x3d   : > { %s834_s2 = scalar_lea.hbm %s1131_s11, 128  ;;  %p836_p3 = pneg %p1138_p13 }
  0x3e   : > { %p835_p0 = scmp.ne.s32.totalorder %s1131_s11, %s834_s2  ;;  %s839_s29 = scalar_lea.hbm %s1282_s0, 256 }
  0x3f   : > { %p840_p9 = scmp.lt.u32.totalorder %s1131_s11, %s1282_s0  ;;  %p841_p1 = scmp.lt.u32.totalorder %s839_s29, %s834_s2 }
  0x40   : > { %p837_p5 = pnand %p836_p3, %p835_p0  ;;  %p843_p4 = scmp.lt.u32.totalorder %s834_s2, %s1131_s11 }
  0x41   : > { %p842_p2 = por %p841_p1, %p840_p9 }
  0x42   : > { %p838_p7 = pneg %p837_p5 }
  0x43   : > { %p844_p6 = por %p843_p4, %p842_p2 }
  0x45   : > { %p845_p8 = pnand %p844_p6, %p838_p7 }
  0x47   : > { %848 = shalt.err (!%p845_p8)
}
  0x48   : > { %s849_s27 = scalar_lea.vmem %s1134_s13, 128  ;;  %s989_s8 = smov [#allocation2]  }
  0x49   : > { %p850_p11 = scmp.ne.s32.totalorder %s1134_s13, %s849_s27  ;;  %s854_s26 = sshll.u32 %s989_s8, 4  ;;  %s855_s26 = int_to_ptr.vmem [resolvable:$false] %s854_s26 }
  0x4a   : > { %s856_s19 = scalar_lea.vmem %s855_s26, 256  ;;  %p857_p5 = scmp.lt.s32.totalorder %s1134_s13, %s855_s26 }
  0x4b   : > { %p852_p12 = pnand %p850_p11, %p836_p3  ;;  %p858_p9 = scmp.lt.s32.totalorder %s856_s19, %s849_s27 }
  0x4d   : > { %p853_p0 = pneg %p852_p12  ;;  %p859_p1 = por %p858_p9, %p857_p5 }
  0x4f   : > { %p860_p2 = pnand %p859_p1, %p853_p0 }
  0x51   : > { %863 = shalt.err (!%p860_p2)
}
  0x52   : > { %737 = dma.hbm_to_vmem [thread:$0]  (!%p1138_p13), %s1131_s11, 128, %s1134_s13, %s202_s10  }
  0x53   : > { %s224_s2 = scalar_lea.vmem [#allocation5], %s1122_s6  ;;  %s221_s30 = scalar_lea.sflag [#allocation6], %s220_s9 }
  0x54   : > { %s235_s29 = sshll.u32 %s224_s2, 4  ;;  %s864_s12 = scalar_lea.hbm %s1145_s5, 128  ;;  %s236_s29 = int_to_ptr.vmem [resolvable:$true] %s235_s29 }
  0x55   : > { %p865_p7 = scmp.ne.s32.totalorder %s1145_s5, %s864_s12  ;;  %s869_s8 = scalar_lea.hbm %s1283_s1, 256 }
  0x56   : > { %p870_p8 = scmp.lt.u32.totalorder %s1145_s5, %s1283_s1  ;;  %p871_p11 = scmp.lt.u32.totalorder %s869_s8, %s864_s12 }
  0x57   : > { %p867_p4 = pnand %p865_p7, %p836_p3  ;;  %p873_p0 = scmp.lt.u32.totalorder %s864_s12, %s1145_s5 }
  0x58   : > { %p872_p12 = por %p871_p11, %p870_p8 }
  0x59   : > { %p868_p6 = pneg %p867_p4 }
  0x5a   : > { %p874_p5 = por %p873_p0, %p872_p12 }
  0x5c   : > { %p875_p9 = pnand %p874_p5, %p868_p6 }
  0x5e   : > { %878 = shalt.err (!%p875_p9)
}
  0x5f   : > { %s879_s6 = scalar_lea.vmem %s236_s29, 128  ;;  %s990_s11 = smov [#allocation5]  }
  0x60   : > { %p880_p1 = scmp.ne.s32.totalorder %s236_s29, %s879_s6  ;;  %s884_s13 = sshll.u32 %s990_s11, 4  ;;  %s885_s13 = int_to_ptr.vmem [resolvable:$false] %s884_s13 }
  0x61   : > { %s886_s9 = scalar_lea.vmem %s885_s13, 256  ;;  %p887_p4 = scmp.lt.s32.totalorder %s236_s29, %s885_s13 }
  0x62   : > { %p882_p2 = pnand %p880_p1, %p836_p3  ;;  %p888_p10 = scmp.lt.s32.totalorder %s886_s9, %s879_s6 }
  0x64   : > { %p883_p7 = pneg %p882_p2  ;;  %p889_p8 = por %p888_p10, %p887_p4 }
  0x66   : > { %p890_p11 = pnand %p889_p8, %p883_p7 }
  0x68   : > { %893 = shalt.err (!%p890_p11)
}
  0x69   : > { %740 = dma.hbm_to_vmem [thread:$0]  (!%p1138_p13), %s1145_s5, 128, %s236_s29, %s221_s30  }
  0x6a   : > { %p1305_p6 = scmp.ne.s32.totalorder %s1297_s25, 0 }
  0x6b   : > { %s1198_s10 = sand.u32 (!%p1305_p6), 1, %s968_s16   ;;  %p1306_p10 = scmp.ne.s32.totalorder (!%p1305_p6), %s1295_s23, 0 }
  0x6c   : > { %244 = sbr.rel (%p1305_p6) target bundleno = 485 (0x1e5), region = 36  ;;  %s1201_s2 = sshll.u32 (!%p1305_p6), %s1198_s10, 3 }
  0x6d   : > { %s247_s12 = scalar_lea.sflag (!%p1305_p6), [#allocation3], %s1198_s10  ;;  %s250_s22 = scalar_lea.vmem (!%p1305_p6), [#allocation2], %s1201_s2 }
  0x73   : > { %947 = dma.done.wait (%p1306_p10), %s247_s12, 128  }
  0x74   : > { %949 = vsyncadd (%p1306_p10), %s247_s12, 4294967168  ;;  %s255_s25 = sand.u32 1, %s1053_s21   ;;  %s259_s5 = scalar_lea.vmem [#allocation5], %s1201_s2 }
  0x75   : > { %s256_s14 = scalar_lea.sflag [#allocation6], %s255_s25 }
  0x76   : > { %951 = dma.done.wait (%p1306_p10), %s256_s14, 128  }
  0x77   : > { %953 = vsyncadd (%p1306_p10), %s256_s14, 4294967168  ;;  %p1307_p13 = scmp.eq.s32.totalorder %s1053_s21, 0 }
  0x79   : > { %955 = dma.done.wait (%p1307_p13), [#allocation6], 384   ;;  %p1308_p3 = pmov %p1307_p13 }
  0x7a   : > { %v991_v0 = vmov 0.0   ;;  %vm992_vm0 = vmmov 0   ;;  %v993_v1 = vmov 0   ;;  %v296_v2 = vld [vmem:[%s250_s22] sm:$0xff]  ;;  %vm310_vm1 = vcmask 64512   ;;  %s994_s23 = smov 126  }
  0x7b   : > { %957 = vsyncadd (%p1308_p3), [#allocation6], 4294966912  ;;  %705 = vmatprep.subr.mxu0 %v991_v0  ;;  %710 = vmatprep.subr.mxu1 %v991_v0  ;;  %s995_s29 = smov 127   ;;  %v298_v3 = vld [vmem:[#allocation7] sm:$0xff]  ;;  %v297_v4 = vld [vmem:[%s259_s5] sm:$0xff]  ;;  %vm307_vm2 = vcmask 1039360  }
  0x7c   : > { %707 = vmatprep.mubr.msk.f32.mxu0 %vm992_vm0, %v991_v0  ;;  %712 = vmatprep.mubr.msk.f32.mxu1 %vm992_vm0, %v991_v0  ;;  %v540_v5 = vld [vmem:[%s1285_s3] sm:$0xff]  ;;  %vm463_vm3 = vcmask 1031168   ;;  %v300_v10 = vld [vmem:[#allocation7 + $0x8] sm:$0xff]  ;;  %v458_v13 = vld [vmem:[#allocation7 + $0x10] sm:$0xff]  ;;  %s696_s27 = sshll.u32 %s976_s18, 7  ;;  %s292_s8 = scalar_lea.vmem [#allocation8], %s1201_s2 }
  0x7d   : > { %805 = vset.pattern.permute.xlu0 %v993_v1  ;;  %459 = vrot.lane.b32.xlu1 %v296_v2, %s994_s23  ;;  %s565_s26 = sshll.u32 %s292_s8, 4  ;;  %s1233_s11 = scalar_lea.hbm %s1286_s4, %s696_s27  ;;  %s1235_s26 = int_to_ptr.vmem [resolvable:$true] %s565_s26 }
  0x7e   : > { %303 = vrot.lane.b32.xlu0 %v296_v2, %s995_s29  ;;  %711 = vmatpush3.msra.mxu1 %v296_v2  ;;  %s551_s13 = scalar_lea.sflag [#allocation4], %s1198_s10  ;;  %s894_s9 = scalar_lea.vmem %s1235_s26, 128 }
  0x7f   : > { %713 = vmatmul.mubr.msk.f32.vlgmr.msra.gmra.mrb[0].mxu1 %vm310_vm1, %v298_v3  ;;  %p895_p12 = scmp.ne.s32.totalorder %s1235_s26, %s894_s9  ;;  %p1309_p0 = scmp.ne.s32.totalorder %s1303_s28, 0 }
  0x80   : > { %s996_s18 = smov [#allocation8]  }
  0x81   : > { %461 = vrot.lane.b32.xlu1 %v297_v4, %s994_s23  ;;  %p896_p5 = pnand %p895_p12, %p1309_p0  ;;  %s898_s2 = sshll.u32 %s996_s18, 4  ;;  %s899_s2 = int_to_ptr.vmem [resolvable:$false] %s898_s2 }
  0x82   : > { %305 = vrot.lane.b32.xlu0 %v297_v4, %s995_s29  ;;  %s900_s12 = scalar_lea.vmem %s899_s2, 256  ;;  %p901_p1 = scmp.lt.s32.totalorder %s1235_s26, %s899_s2 }
  0x83   : > { %p897_p9 = pneg %p896_p5  ;;  %p902_p2 = scmp.lt.s32.totalorder %s900_s12, %s894_s9 }
  0x85   : > { %p903_p7 = por %p902_p2, %p901_p1 }
  0x86   : > { %543 = vperm.xlu0 %805, %v540_v5  }
  0x87   : > { %p904_p4 = pnand %p903_p7, %p897_p9 }
  0xef   : > { %v460_v6 = vpop.permute.xlu1 %459 }
  0xf0   : > { %v304_v7 = vpop.permute.xlu0 %303 }
  0xf3   : > { %v462_v8 = vpop.permute.xlu1 %461 }
  0xf4   : > { %v306_v9 = vpop.permute.xlu0 %305  ;;  %v464_v12 = vsel %vm463_vm3, %v460_v6, %v462_v8 }
  0xf5   : > { %v308_v11 = vsel %vm307_vm2, %v304_v7, %v306_v9 }
  0xf6   : > { %706 = vmatpush3.msra.mxu0 %v308_v11 }
  0xf7   : > { %708 = vmatmul.mubr.msk.f32.vlgmr.msra.gmra.mrb[0].mxu0 %vm310_vm1, %v300_v10  ;;  %715 = vmatprep.subr.mxu0 %v991_v0 }
  0xf8   : > { %716 = vmatpush3.msra.mxu0 %v464_v12  ;;  %717 = vmatprep.mubr.msk.f32.mxu0 %vm992_vm0, %v991_v0 }
  0xfb   : > { %718 = vmatmul.mubr.msk.f32.vlgmr.msra.gmra.mrb[2].mxu0 %vm310_vm1, %v458_v13 }
 0x105   : > { %v544_v20 = vpop.permute.xlu0 %543 }
 0x152   : > { %v453_v14 = vpop.f32.mrb[0].mxu1 }
 0x153   : > { %v714_v15 = vpop.f32.mrb[1].mxu1 }
 0x1ca   : > { %v380_v16 = vpop.f32.mrb[0].mxu0 }
 0x1cb   : > { %v709_v17 = vpop.f32.mrb[1].mxu0  ;;  %v454_v18 = vadd.f32 %v453_v14, %v380_v16 }
 0x1ce   : > { %v535_v19 = vpop.f32.mrb[2].mxu0 }
 0x1cf   : > { %v539_v21 = vadd.f32 %v535_v19, %v454_v18  ;;  %v719_v22 = vpop.f32.mrb[3].mxu0 }
 0x1d1   : > { %v546_v23 = vadd.f32 %v544_v20, %v539_v21 }
 0x1d3   : > { %v547_v24 = vmax.f32 %v546_v23, 0.0 }
 0x1d5   : > { %v548_v25 = vadd.f32 %v547_v24, %v308_v11 }
 0x1d7   : > { %549 = vst [vmem:[%s292_s8] sm:$0xff] %v548_v25 }
 0x1d8   : > { %907 = shalt.err (!%p904_p4)
}
 0x1d9   : > { %s908_s10 = scalar_lea.hbm %s1233_s11, 128  ;;  %s912_s14 = scalar_lea.hbm %s1286_s4, 256 }
 0x1da   : > { %p909_p8 = scmp.ne.s32.totalorder %s1233_s11, %s908_s10  ;;  %p913_p10 = scmp.lt.u32.totalorder %s1233_s11, %s1286_s4 }
 0x1db   : > { %p914_p13 = scmp.lt.u32.totalorder %s912_s14, %s908_s10  ;;  %p916_p12 = scmp.lt.u32.totalorder %s908_s10, %s1233_s11 }
 0x1dc   : > { %p910_p11 = pnand %p909_p8, %p1309_p0 }
 0x1dd   : > { %p915_p3 = por %p914_p13, %p913_p10 }
 0x1de   : > { %p911_p6 = pneg %p910_p11 }
 0x1df   : > { %p917_p5 = por %p916_p12, %p915_p3 }
 0x1e1   : > { %p918_p9 = pnand %p917_p5, %p911_p6 }
 0x1e3   : > { %921 = shalt.err (!%p918_p9)
}
 0x1e4   : > { %728 = dma.vmem_to_hbm [thread:$0]  (%p1309_p0), %s1235_s26, 128, %s1233_s11, %s551_s13  }
 0x1e5 PF: > { %s577_s29 = sand.u32 1, %s964_s15   ;;  %p1310_p1 = scmp.ne.s32.totalorder %s1296_s24, 0 }
 0x1e6   : > { %p1311_p2 = scmp.ge.s32.totalorder %s984_s20, 2  ;;  %s578_s21 = scalar_lea.sflag [#allocation4], %s577_s29 }
 0x1e8   : > { %p742_p7 = pnand %p1311_p2, %p1310_p1 }
 0x1ea   : > { %959 = dma.done.wait (!%p742_p7), %s578_s21, 128  }
 0x1eb   : > { %961 = vsyncadd (!%p742_p7), %s578_s21, 4294967168  ;;  %s23_s20 = sadd.s32 1, %s984_s20   ;;  %s1312_s18 = sld [smem:[#allocation13_spill]] }
 0x1ec   : > { %p20_p4 = scmp.ge.s32.totalorder %s23_s20, 4   ;;  %s1313_s19 = sld [smem:[#allocation14_spill]] }
 0x1ed   : > { %s1314_s15 = smov %s968_s16  ;;  %s1315_s16 = smov %s972_s17 }
 0x1ee   : > { %s1316_s17 = smov %s1125_s7  ;;  %22 = sbr.rel (!%p20_p4) target bundleno = 10 (0xa), region = 100 }
 0x1f5   :  { %583 = vsyncpa [#allocation3], 1 }
 0x1f6   :  { %585 = vsyncpa [#allocation3 + $0x1], 1 }
 0x1f7   :  { %586 = vsyncpa [#allocation6], 1 }
 0x1f8   :  { %588 = vsyncpa [#allocation6 + $0x1], 1 }
 0x1f9   :  { %589 = vsyncpa [#allocation4], 1 }
 0x1fa   :  { %591 = vsyncpa [#allocation4 + $0x1], 1 }

</bundles_post_ra>
